<compile_context>
chip_gen: v6e
topology: v6e:2x2x1
jax: 0.10.0
libtpu: 0.0.40
codegen_flags: <defaults>
</compile_context>

<pallas_src>
import functools

import jax
import jax.numpy as jnp
from jax.experimental import pallas as pl
from jax.experimental.pallas import tpu as pltpu


def _round_up(x, m):
    return ((x + m - 1) // m) * m


def _feat_transfer_kernel(adj_ref, w_ref, b_ref, out_ref, *, mm_dtype):
    """One row tile, all T time steps.

    adj_ref : (T, tm, Ft_in)    row-tile of all T time steps (input dtype)
    w_ref   : (Ft_in, Ft_out)   weight (in x out), VMEM-resident
    b_ref   : (1, Ft_out)       bias
    out_ref : (tm, T * Ft_out)  packed output tile (final layout, no padding)
    """
    T = adj_ref.shape[0]
    ft_out = w_ref.shape[1]

    # Hoisted once (the t-loop below is a static unroll over a single trace).
    w = w_ref[...].astype(mm_dtype)
    b = b_ref[...]

    for t in range(T):
        x_t = adj_ref[t].astype(mm_dtype)                         # (tm, ft_in)
        y_t = jnp.dot(x_t, w, preferred_element_type=jnp.float32)  # MXU, f32 acc
        # dropout == identity in eval mode, then ReLU.
        y_t = jnp.maximum(y_t + b, 0.0)
        # Store immediately -> intermediate liveness bounded to ~one chunk.
        out_ref[:, t * ft_out:(t + 1) * ft_out] = y_t.astype(out_ref.dtype)


def _vmem_capacity_bytes():
    try:
        return int(pltpu.get_tpu_info().vmem_capacity_bytes)
    except Exception:
        return 64 << 20   # conservative fallback == v7x per-core VMEM


def _pick_row_tile(N, T, ft_in, ft_out, in_itemsize, mm_itemsize, budget_bytes):
    """Largest row tile (divisor of N, sublane-aligned) whose *real* VMEM
    footprint fits the budget, preferring >= 4 grid steps (>= 2 minimum) so
    the pipeline overlaps DMA/compute and v7x can shard across both cores."""
    sublane = max(8, 32 // in_itemsize)       # 8 for f32, 16 bf16, 32 int8
    ft_in_l = _round_up(ft_in, 128)           # lane padding of minor dims
    ft_out_l = _round_up(ft_out, 128)
    out_row_l = _round_up(T * ft_out, 128)

    def vmem_need(tm):
        tm_s = _round_up(tm, sublane)         # sublane padding
        in_blk = T * tm_s * ft_in_l * in_itemsize
        out_blk = tm_s * out_row_l * in_itemsize
        w_blk = _round_up(ft_in, 8) * ft_out_l * 4
        b_blk = 8 * ft_out_l * 4
        # In-body intermediates: casted x_t / w copies + the f32 y_t result;
        # allow two chunks live in case the scheduler overlaps consecutive t.
        live = 2 * (tm_s * ft_out_l * 4
                    + tm_s * ft_in_l * mm_itemsize
                    + _round_up(ft_in, 8) * ft_out_l * mm_itemsize)
        # Pipelined blocks are double-buffered; weight/bias counted x2 too
        # (conservative, since we do not request Buffered(1) for them).
        return 2 * (in_blk + out_blk + w_blk + b_blk) + live

    cands = [c for c in range(min(N, 2048), sublane - 1, -1)
             if N % c == 0 and c % sublane == 0]

    # Prefer >= 4 grid steps without shrinking tiles below 256 rows, then
    # >= 2 steps, then anything that fits the budget.
    for min_tiles, min_rows in ((4, 256), (2, sublane), (1, sublane)):
        for c in cands:
            if c >= min_rows and N // c >= min_tiles and vmem_need(c) <= budget_bytes:
                return c
    return N   # tiny / irregular N: single full-extent block


def feat_transfer_forward(adj_stack, weight, bias, *, matmul_dtype=None):
    """adj_stack: [T, N, Ft_in] (stack of adj_tnr_list); weight: [Ft_out, Ft_in]
    (PyTorch nn.Linear layout); bias: [Ft_out].
    matmul_dtype: optional dtype fed to the MXU (e.g. jnp.bfloat16); the
    accumulation stays f32.  None => exact nn.Linear numerics in input dtype.
    Returns [N, T, Ft_out]  (== torch.stack(outputs).permute(1, 0, 2))."""
    T, N, ft_in = adj_stack.shape
    ft_out = weight.shape[0]
    mm_dtype = jnp.dtype(matmul_dtype) if matmul_dtype is not None else adj_stack.dtype

    w_t = weight.T                      # (Ft_in, Ft_out): x @ W^T
    b2 = bias.reshape(1, ft_out)

    in_itemsize = jnp.dtype(adj_stack.dtype).itemsize
    mm_itemsize = jnp.dtype(mm_dtype).itemsize

    # Generation-aware VMEM budget / scoped limit (v7x: ~24 / 48 MiB;
    # v5e/v6e: ~48 / 96 MiB).
    vmem_cap = _vmem_capacity_bytes()
    budget = (vmem_cap * 3) // 8
    vmem_limit = (vmem_cap * 3) // 4

    row_tile = _pick_row_tile(N, T, ft_in, ft_out, in_itemsize, mm_itemsize, budget)
    n_tiles = N // row_tile

    cost = pl.CostEstimate(
        flops=2 * N * T * ft_in * ft_out,
        transcendentals=0,
        bytes_accessed=(adj_stack.size * in_itemsize
                        + (weight.size + bias.size) * jnp.dtype(weight.dtype).itemsize
                        + N * T * ft_out * in_itemsize),
    )

    kernel = functools.partial(_feat_transfer_kernel, mm_dtype=mm_dtype)

    out_packed = pl.pallas_call(
        kernel,
        out_shape=jax.ShapeDtypeStruct((N, T * ft_out), adj_stack.dtype),
        grid_spec=pltpu.PrefetchScalarGridSpec(
            num_scalar_prefetch=0,
            grid=(n_tiles,),
            in_specs=[
                # Row tile across all T time steps.
                pl.BlockSpec((T, row_tile, ft_in), lambda i: (0, i, 0)),
                # Weight / bias: constant block index -> VMEM-resident.
                pl.BlockSpec((ft_in, ft_out), lambda i: (0, 0)),
                pl.BlockSpec((1, ft_out), lambda i: (0, 0)),
            ],
            out_specs=pl.BlockSpec((row_tile, T * ft_out), lambda i: (i, 0)),
        ),
        compiler_params=pltpu.CompilerParams(
            dimension_semantics=("parallel",),
            vmem_limit_bytes=vmem_limit,
        ),
        cost_estimate=cost,
    )(adj_stack, w_t, b2)

    # Free row-major reshape to [N, T, Ft_out] -- no slice, no extra HBM pass.
    return out_packed.reshape(N, T, ft_out)


if __name__ == "__main__":
    # Small shapes consistent with the module's forward:
    #   T = 3 time steps, each adj of shape [N, Ft_in]
    T, N, Ft_in, Ft_out = 3, 16, 32, 64
    dropout_rate = 0.1  # identity at inference

    key = jax.random.PRNGKey(0)
    k_adj, k_w, k_b = jax.random.split(key, 3)

    # Deterministic "list" of adjacency tensors, stacked as [T, N, Ft_in]
    adj_stack = jax.random.normal(k_adj, (T, N, Ft_in), dtype=jnp.float32)

    # Deterministic Linear params (PyTorch nn.Linear layout: [Ft_out, Ft_in])
    bound = 1.0 / (Ft_in ** 0.5)
    weight = jax.random.uniform(k_w, (Ft_out, Ft_in), jnp.float32, -bound, bound)
    bias = jax.random.uniform(k_b, (Ft_out,), jnp.float32, -bound, bound)

    # Reference in plain JAX (eval-mode dropout == identity)
    ref = jnp.maximum(jnp.einsum("tnf,of->tno", adj_stack, weight) + bias, 0.0)
    ref = jnp.transpose(ref, (1, 0, 2))

    # Faithful f32 path (exact nn.Linear numerics).
    out = jax.block_until_ready(feat_transfer_forward(adj_stack, weight, bias))
    assert out.shape == (N, T, Ft_out)
    assert jnp.allclose(out, ref, atol=1e-5, rtol=1e-5)

    # bf16-fed MXU path (bandwidth/perf option), f32 accumulation -> loose check.
    out_bf16 = jax.block_until_ready(
        feat_transfer_forward(adj_stack, weight, bias, matmul_dtype=jnp.bfloat16))
    assert out_bf16.shape == (N, T, Ft_out)
    assert jnp.allclose(out_bf16, ref, atol=5e-2, rtol=5e-2)

    print("KERNEL_OK")
</pallas_src>

<mosaic_0001>
module attributes {stable_mosaic.version = 11 : i64} {
  func.func @_feat_transfer_kernel(%arg0: i32, %arg1: memref<3x8x32xf32, #tpu.memory_space<vmem>>, %arg2: memref<32x64xf32, #tpu.memory_space<vmem>>, %arg3: memref<1x64xf32, #tpu.memory_space<vmem>>, %arg4: memref<8x192xf32, #tpu.memory_space<vmem>>) attributes {dimension_semantics = [#tpu.dimension_semantics<parallel>], iteration_bounds = array<i64: 2>, scalar_prefetch = 0 : i64, scratch_operands = 0 : i64, tpu.core_type = #tpu.core_type<tc>, window_params = [{transform_indices = @transform_0, window_bounds = array<i64: 3, 8, 32>}, {pipeline_mode = #tpu.pipeline_mode<synchronous>, transform_indices = @transform_1, window_bounds = array<i64: 32, 64>}, {pipeline_mode = #tpu.pipeline_mode<synchronous>, transform_indices = @transform_2, window_bounds = array<i64: 1, 64>}, {transform_indices = @transform_3, window_bounds = array<i64: 8, 192>}]} {
    %c0 = arith.constant 0 : index
    %c0_0 = arith.constant 0 : index
    %0 = vector.load %arg2[%c0, %c0_0] : memref<32x64xf32, #tpu.memory_space<vmem>>, vector<32x64xf32>
    %c0_1 = arith.constant 0 : index
    %c0_2 = arith.constant 0 : index
    %1 = vector.load %arg3[%c0_1, %c0_2] : memref<1x64xf32, #tpu.memory_space<vmem>>, vector<1x64xf32>
    %c0_3 = arith.constant 0 : index
    %c0_4 = arith.constant 0 : index
    %c0_5 = arith.constant 0 : index
    %2 = vector.load %arg1[%c0_3, %c0_4, %c0_5] : memref<3x8x32xf32, #tpu.memory_space<vmem>>, vector<1x8x32xf32>
    %3 = vector.shape_cast %2 : vector<1x8x32xf32> to vector<8x32xf32>
    %cst = arith.constant dense<0.000000e+00> : vector<8x64xf32>
    %4 = tpu.matmul %3, %0, %cst {dimension_numbers = #tpu.dot_dimension_numbers<[1], [0], [0], [1], [0, 0, 1, 1], [], []>} : vector<8x32xf32>, vector<32x64xf32>, vector<8x64xf32> -> vector<8x64xf32>
    %5 = vector.broadcast %1 : vector<1x64xf32> to vector<8x64xf32>
    %6 = arith.addf %4, %5 : vector<8x64xf32>
    %cst_6 = arith.constant 0.000000e+00 : f32
    %7 = vector.broadcast %cst_6 : f32 to vector<8x64xf32>
    %8 = arith.maximumf %6, %7 : vector<8x64xf32>
    %c0_7 = arith.constant 0 : index
    %c0_8 = arith.constant 0 : index
    %9 = vector.load %arg4[%c0_7, %c0_8] : memref<8x192xf32, #tpu.memory_space<vmem>>, vector<8x64xf32>
    tpu.vector_store %arg4[%c0_7, %c0_8], %8 {strides = array<i32>} : memref<8x192xf32, #tpu.memory_space<vmem>>, vector<8x64xf32>,
    %c1 = arith.constant 1 : index
    %c0_9 = arith.constant 0 : index
    %c0_10 = arith.constant 0 : index
    %10 = vector.load %arg1[%c1, %c0_9, %c0_10] : memref<3x8x32xf32, #tpu.memory_space<vmem>>, vector<1x8x32xf32>
    %11 = vector.shape_cast %10 : vector<1x8x32xf32> to vector<8x32xf32>
    %cst_11 = arith.constant dense<0.000000e+00> : vector<8x64xf32>
    %12 = tpu.matmul %11, %0, %cst_11 {dimension_numbers = #tpu.dot_dimension_numbers<[1], [0], [0], [1], [0, 0, 1, 1], [], []>} : vector<8x32xf32>, vector<32x64xf32>, vector<8x64xf32> -> vector<8x64xf32>
    %13 = vector.broadcast %1 : vector<1x64xf32> to vector<8x64xf32>
    %14 = arith.addf %12, %13 : vector<8x64xf32>
    %cst_12 = arith.constant 0.000000e+00 : f32
    %15 = vector.broadcast %cst_12 : f32 to vector<8x64xf32>
    %16 = arith.maximumf %14, %15 : vector<8x64xf32>
    %c0_13 = arith.constant 0 : index
    %c64 = arith.constant 64 : index
    %17 = vector.load %arg4[%c0_13, %c64] : memref<8x192xf32, #tpu.memory_space<vmem>>, vector<8x64xf32>
    tpu.vector_store %arg4[%c0_13, %c64], %16 {strides = array<i32>} : memref<8x192xf32, #tpu.memory_space<vmem>>, vector<8x64xf32>,
    %c2 = arith.constant 2 : index
    %c0_14 = arith.constant 0 : index
    %c0_15 = arith.constant 0 : index
    %18 = vector.load %arg1[%c2, %c0_14, %c0_15] : memref<3x8x32xf32, #tpu.memory_space<vmem>>, vector<1x8x32xf32>
    %19 = vector.shape_cast %18 : vector<1x8x32xf32> to vector<8x32xf32>
    %cst_16 = arith.constant dense<0.000000e+00> : vector<8x64xf32>
    %20 = tpu.matmul %19, %0, %cst_16 {dimension_numbers = #tpu.dot_dimension_numbers<[1], [0], [0], [1], [0, 0, 1, 1], [], []>} : vector<8x32xf32>, vector<32x64xf32>, vector<8x64xf32> -> vector<8x64xf32>
    %21 = vector.broadcast %1 : vector<1x64xf32> to vector<8x64xf32>
    %22 = arith.addf %20, %21 : vector<8x64xf32>
    %cst_17 = arith.constant 0.000000e+00 : f32
    %23 = vector.broadcast %cst_17 : f32 to vector<8x64xf32>
    %24 = arith.maximumf %22, %23 : vector<8x64xf32>
    %c0_18 = arith.constant 0 : index
    %c128 = arith.constant 128 : index
    %25 = vector.load %arg4[%c0_18, %c128] : memref<8x192xf32, #tpu.memory_space<vmem>>, vector<8x64xf32>
    tpu.vector_store %arg4[%c0_18, %c128], %24 {strides = array<i32>} : memref<8x192xf32, #tpu.memory_space<vmem>>, vector<8x64xf32>,
    return
  }
  func.func @transform_0(%arg0: i32) -> (i32, i32, i32) {
    %c0_i32 = arith.constant 0 : i32
    %c0_i32_0 = arith.constant 0 : i32
    %c0_i32_1 = arith.constant 0 : i32
    return %c0_i32, %arg0, %c0_i32_0 : i32, i32, i32
  }
  func.func @transform_1(%arg0: i32) -> (i32, i32) {
    %c0_i32 = arith.constant 0 : i32
    %c0_i32_0 = arith.constant 0 : i32
    %c0_i32_1 = arith.constant 0 : i32
    return %c0_i32, %c0_i32_0 : i32, i32
  }
  func.func @transform_2(%arg0: i32) -> (i32, i32) {
    %c0_i32 = arith.constant 0 : i32
    %c0_i32_0 = arith.constant 0 : i32
    %c0_i32_1 = arith.constant 0 : i32
    return %c0_i32, %c0_i32_0 : i32, i32
  }
  func.func @transform_3(%arg0: i32) -> (i32, i32) {
    %c0_i32 = arith.constant 0 : i32
    %c0_i32_0 = arith.constant 0 : i32
    return %arg0, %c0_i32 : i32, i32
  }
}

</mosaic_0001>

<bundles_post_ra>
// kernel: tpu_custom_call.1
= control target key start
LH: loop header
LB: loop body
LE: loop exit
PB: predicated region body
PF: predicated region fallthrough
CT: control target
= control target key end

     0   :  { %8 = vsyncpa [#allocation3], 0  ;;  %s1027_s0 = inlined_call_operand.hbm [shape: f32[3,16,32], index: 0, kind: input, shape index: {}]   ;;  %s1028_s1 = inlined_call_operand.hbm [shape: f32[32,64], index: 1, kind: input, shape index: {}]   ;;  %s1029_s2 = inlined_call_operand.vmem [shape: f32[1,64], index: 2, kind: input, shape index: {}]   ;;  %s1030_s3 = inlined_call_operand.hbm [shape: f32[16,192], index: 3, kind: output, shape index: {}]  }
   0x1   :  { %10 = vsyncpa [#allocation3 + $0x1], 0 }
   0x2   :  { %11 = vsyncpa [#allocation6], 0 }
   0x3   :  { %12 = vsyncpa [#allocation4], 0 }
   0x4   :  { %14 = vsyncpa [#allocation4 + $0x1], 0  ;;  %s832_s12 = smov 0   ;;  %s834_s13 = smov 0  }
   0x5   :  { %s836_s14 = smov 0   ;;  %s838_s15 = smov 0  }
   0x6 LB: > { %s853_s16 = sadd.s32 4294967295, %s801_s15   ;;  %s546_s17 = sadd.s32 4294967294, %s801_s15   ;;  %s801_s15 = sphi %s838_s15, %s1052_s15   ;;  %s797_s14 = sphi %s836_s14, %s1051_s14   ;;  %s793_s13 = sphi %s834_s13, %s1050_s13   ;;  %s789_s12 = sphi %s832_s12, %s1049_s12  }
   0x7   : > { %s857_s18 = sadd.s32 1, %s801_s15   ;;  %s27_s19 = sadd.s32 1, %s797_s14 }
   0x8   : > { %s24_s20 = ssub.s32 %s801_s15, %s857_s18  ;;  %p34_p0 = scmp.ne.s32.totalorder %s797_s14, %s793_s13 }
   0x9   : > { %p25_p1 = scmp.eq.s32.totalorder %s24_s20, 0  ;;  %p35_p2 = scmp.eq.s32.totalorder %s801_s15, 0 }
   0xa   : > { %p40_p3 = scmp.ne.s32.totalorder %s793_s13, %s789_s12  ;;  %p1034_p4 = scmp.eq.s32.totalorder %s853_s16, 0 }
   0xb   : > { %s869_s21 = scalar_select %p25_p1, %s797_s14, %s27_s19  }
   0xc   : > { %p871_p5 = por %p35_p2, %p34_p0  ;;  %p877_p6 = por %p1034_p4, %p40_p3 }
   0xd   : > { %p106_p7 = scmp.eq.s32.totalorder %s853_s16, 1  ;;  %p112_p8 = scmp.eq.s32.totalorder %s546_s17, 1 }
   0xe   : > { %s1036_s23 = scalar_select %p877_p6, 1, 0 }
   0xf   : > { %p547_p9 = scmp.ge.s32.totalorder %s801_s15, 1  ;;  %p119_p10 = scmp.lt.s32.totalorder %s801_s15, 3 }
  0x10   : > { %p884_p11 = por %p106_p7, %p34_p0  ;;  %p888_p12 = por %p112_p8, %p40_p3 }
  0x11   : > { %p892_p13 = pnand %p547_p9, %p119_p10  ;;  %s803_s27 = smov [#allocation5]  }
  0x12   : > { %s1037_s24 = scalar_select %p884_p11, 1, 0 }
  0x13   : > { %s1038_s25 = scalar_select %p888_p12, 1, 0 }
  0x14   : > { %s1039_s26 = scalar_select %p892_p13, 1, 0 }
  0x15   : > { %p624_p1 = pneg %p892_p13  ;;  %s131_s28 = sshll.u32 %s803_s27, 4  ;;  %s132_s28 = int_to_ptr.vmem [resolvable:$true] %s131_s28 }
  0x16   : > { %p637_p3 = scmp.lt.s32.totalorder %s801_s15, 2  ;;  %s148_s30 = sand.u32 1, %s797_s14  }
  0x17   : > { %p900_p2 = pnand %p624_p1, %p1034_p4  ;;  %s690_s4 = scalar_lea.vmem %s132_s28, 512 }
  0x18   : > { %p691_p8 = scmp.ne.s32.totalorder %s132_s28, %s690_s4  ;;  %p698_p12 = scmp.lt.s32.totalorder %s132_s28, %s132_s28 }
  0x19   : > { %p681_p7 = pneg %p900_p2  ;;  %p699_p11 = scmp.lt.s32.totalorder %s690_s4, %s690_s4 }
  0x1b   : > { %p693_p9 = pnand %p691_p8, %p681_p7  ;;  %p700_p6 = por %p699_p11, %p698_p12 }
  0x1d   : > { %p694_p10 = pneg %p693_p9 }
  0x1f   : > { %p701_p13 = pnand %p700_p6, %p694_p10 }
  0x21   : > { %704 = shalt.err (!%p701_p13)
}
  0x22   : > { %s804_s5 = smov 128   ;;  %s805_s6 = smov 8  }
  0x23   : > { %627 = dma.hbm_to_vmem [thread:$0]  (!%p900_p2), %s1028_s1, 512, %s132_s28, [#allocation6], %s804_s5, %s804_s5, %s805_s6  }
  0x24   : > { %p921_p1 = pnand %p637_p3, %p871_p5  ;;  %s614_s10 = smul.u32 24, %s148_s30 }
  0x25   : > { %s550_s11 = sshll.u32 %s801_s15, 7  ;;  %s933_s22 = scalar_lea.sflag [#allocation3], %s148_s30 }
  0x26   : > { %s929_s20 = scalar_lea.hbm %s1027_s0, %s550_s11  ;;  %s152_s27 = scalar_lea.vmem [#allocation2], %s614_s10 }
  0x27   : > { %s158_s29 = sshll.u32 %s152_s27, 4  ;;  %s705_s28 = scalar_lea.hbm %s929_s20, 384  ;;  %s931_s29 = int_to_ptr.vmem [resolvable:$true] %s158_s29 }
  0x28   : > { %p706_p5 = scmp.ne.s32.totalorder %s929_s20, %s705_s28  ;;  %p707_p6 = pneg %p921_p1 }
  0x29   : > { %s710_s8 = scalar_lea.hbm %s1027_s0, 768  ;;  %p711_p13 = scmp.lt.s32.totalorder %s929_s20, %s1027_s0 }
  0x2a   : > { %p708_p11 = pnand %p707_p6, %p706_p5  ;;  %p712_p2 = scmp.lt.s32.totalorder %s710_s8, %s705_s28 }
  0x2c   : > { %p709_p12 = pneg %p708_p11  ;;  %p713_p3 = por %p712_p2, %p711_p13 }
  0x2e   : > { %p714_p7 = pnand %p713_p3, %p709_p12 }
  0x30   : > { %717 = shalt.err (!%p714_p7)
}
  0x31   : > { %s718_s30 = scalar_lea.vmem %s931_s29, 384  ;;  %s806_s10 = smov [#allocation2]  }
  0x32   : > { %p719_p8 = scmp.ne.s32.totalorder %s931_s29, %s718_s30  ;;  %s723_s19 = sshll.u32 %s806_s10, 4  ;;  %s724_s19 = int_to_ptr.vmem [resolvable:$false] %s723_s19 }
  0x33   : > { %s725_s27 = scalar_lea.vmem %s724_s19, 768  ;;  %p726_p5 = scmp.lt.s32.totalorder %s931_s29, %s724_s19 }
  0x34   : > { %p721_p9 = pnand %p719_p8, %p707_p6  ;;  %p727_p11 = scmp.lt.s32.totalorder %s725_s27, %s718_s30 }
  0x36   : > { %p722_p10 = pneg %p721_p9  ;;  %p728_p0 = por %p727_p11, %p726_p5 }
  0x38   : > { %p729_p4 = pnand %p728_p0, %p722_p10 }
  0x3a   : > { %732 = shalt.err (!%p729_p4)
}
  0x3b   : > { %s807_s28 = smov 256   ;;  %p1042_p6 = scmp.ne.s32.totalorder %s1039_s26, 0 }
  0x3c   : > { %631 = dma.hbm_to_vmem [thread:$0]  (!%p921_p1), %s929_s20, 384, %s931_s29, %s933_s22, %s807_s28, %s804_s5, %s805_s6  }
  0x3d   : > { %170 = sbr.rel (%p1042_p6) target bundleno = 405 (0x195), region = 32  ;;  %s959_s4 = sand.u32 (!%p1042_p6), 1, %s793_s13  }
  0x3e   : > { %s615_s7 = smul.u32 (!%p1042_p6), 24, %s959_s4  ;;  %s173_s8 = scalar_lea.sflag (!%p1042_p6), [#allocation3], %s959_s4 }
  0x3f   : > { %p1043_p4 = scmp.ne.s32.totalorder (!%p1042_p6), %s1036_s23, 0 }
  0x40   : > { %s963_s11 = scalar_lea.vmem (!%p1042_p6), [#allocation2], %s615_s7 }
  0x42   : > { %776 = dma.done.wait (%p1043_p4), %s173_s8, 384  }
  0x43   : > { %778 = vsyncadd (%p1043_p4), %s173_s8, 4294966912  ;;  %p1044_p0 = scmp.eq.s32.totalorder %s853_s16, 0 }
  0x45   : > { %780 = dma.done.wait (%p1044_p0), [#allocation6], 512   ;;  %p1045_p1 = pmov %p1044_p0 }
  0x46   : > { %v808_v0 = vmov 0.0   ;;  %vm809_vm0 = vmmov 0   ;;  %v206_v1 = vld [vmem:[#allocation5 + $0x18] sm:$0xff]  ;;  %v205_v2 = vld [vmem:[#allocation5 + $0x10] sm:$0xff]  ;;  %v204_v3 = vld [vmem:[#allocation5 + $0x8] sm:$0xff]  ;;  %vm215_vm1 = vcmask 261120  }
  0x47   : > { %782 = vsyncadd (%p1045_p1), [#allocation6], 4294966784  ;;  %592 = vmatprep.subr.mxu1 %v808_v0  ;;  %600 = vmatprep.mubr.msk.f32.mxu1 %vm809_vm0, %v808_v0  ;;  %v203_v4 = vld [vmem:[#allocation5] sm:$0xff]  ;;  %v556_v5 = vld [vmem:[%s963_s11 + $0x8] sm:$0xff]  ;;  %s553_s5 = sshll.u32 %s959_s4, 4  ;;  %vm290_vm2 = vcmask 523264  }
  0x48   : > { %581 = vmatprep.subr.mxu0 %v808_v0  ;;  %589 = vmatprep.mubr.msk.f32.mxu0 %vm809_vm0, %v808_v0  ;;  %v208_v6 = vld [vmem:[%s963_s11] sm:$0xff]  ;;  %v558_v7 = vld [vmem:[%s963_s11 + $0x10] sm:$0xff]  ;;  %s810_s6 = smov 64   ;;  %s202_s9 = scalar_lea.vmem [#allocation7], %s553_s5  ;;  %vm372_vm3 = vcmask 1048064  }
  0x49   : > { %593 = vmatpush3.msra.mxu1 %v206_v1  ;;  %582 = vmatpush3.msra.mxu0 %v206_v1  ;;  %v554_v8 = vld [vmem:[%s1029_s2] ss:$0 sm:$0xff]  ;;  %s565_s20 = sshll.u32 %s853_s16, 8  ;;  %s466_s29 = sshll.u32 %s202_s9, 4  ;;  %s467_s29 = int_to_ptr.vmem [resolvable:$true] %s466_s29 }
  0x4a   : > { %594 = vmatprep.subr.mxu1 %v808_v0  ;;  %583 = vmatprep.subr.mxu0 %v808_v0  ;;  %s990_s30 = scalar_lea.hbm %s1030_s3, %s565_s20  ;;  %s452_s10 = scalar_lea.sflag [#allocation4], %s959_s4 }
  0x4b   : > { %595 = vmatpush3.msra.mxu1 %v205_v2  ;;  %584 = vmatpush3.msra.mxu0 %v205_v2  ;;  %s733_s19 = scalar_lea.vmem %s467_s29, 256  ;;  %p1046_p13 = scmp.ne.s32.totalorder %s1037_s24, 0 }
  0x4c   : > { %596 = vmatprep.subr.mxu1 %v808_v0  ;;  %585 = vmatprep.subr.mxu0 %v808_v0  ;;  %p734_p12 = scmp.ne.s32.totalorder %s467_s29, %s733_s19  ;;  %s811_s27 = smov [#allocation7]  }
  0x4d   : > { %597 = vmatpush3.msra.mxu1 %v204_v3  ;;  %586 = vmatpush3.msra.mxu0 %v204_v3  ;;  %s737_s28 = sshll.u32 %s811_s27, 4  ;;  %s738_s28 = int_to_ptr.vmem [resolvable:$false] %s737_s28 }
  0x4e   : > { %598 = vmatprep.subr.mxu1 %v808_v0  ;;  %587 = vmatprep.subr.mxu0 %v808_v0  ;;  %p735_p2 = pnand %p734_p12, %p1046_p13  ;;  %s739_s16 = scalar_lea.vmem %s738_s28, 512 }
  0x4f   : > { %599 = vmatpush3.msra.mxu1 %v203_v4  ;;  %588 = vmatpush3.msra.mxu0 %v203_v4  ;;  %p740_p7 = scmp.lt.s32.totalorder %s467_s29, %s738_s28  ;;  %p741_p8 = scmp.lt.s32.totalorder %s739_s16, %s733_s19 }
  0x50   : > { %601 = vmatmul.mubr.msk.f32.vlgmr.msra.gmra.mxu1 %vm215_vm1, %v556_v5  ;;  %603 = vmatprep.subr.mxu0 %v808_v0  ;;  %p736_p3 = pneg %p735_p2 }
  0x51   : > { %590 = vmatmul.mubr.msk.f32.vlgmr.msra.gmra.mxu0 %vm215_vm1, %v208_v6  ;;  %p742_p9 = por %p741_p8, %p740_p7 }
  0x52   : > { %604 = vmatpush3.msra.mxu0 %v206_v1  ;;  %611 = vmatprep.mubr.msk.f32.mxu0 %vm809_vm0, %v808_v0 }
  0x53   : > { %605 = vmatprep.subr.mxu0 %v808_v0  ;;  %p743_p10 = pnand %p742_p9, %p736_p3 }
  0x54   : > { %606 = vmatpush3.msra.mxu0 %v205_v2 }
  0x55   : > { %607 = vmatprep.subr.mxu0 %v808_v0 }
  0x56   : > { %608 = vmatpush3.msra.mxu0 %v204_v3 }
  0x57   : > { %609 = vmatprep.subr.mxu0 %v808_v0 }
  0x58   : > { %610 = vmatpush3.msra.mxu0 %v203_v4 }
  0x59   : > { %612 = vmatmul.mubr.msk.f32.vlgmr.msra.gmra.mxu0 %vm215_vm1, %v558_v7 }
 0x110   : > { %v363_v9 = vpop.f32.mrf.mxu1 }
 0x111   : > { %v364_v10 = vadd.f32 %v554_v8, %v363_v9  ;;  %v285_v11 = vpop.f32.mrf.mxu0 }
 0x112   : > { %v602_v12 = vpop.f32.mrf.mxu1  ;;  %v286_v13 = vadd.f32 %v554_v8, %v285_v11 }
 0x113   : > { %v367_v14 = vmax.f32 %v364_v10, 0.0  ;;  %v591_v15 = vpop.f32.mrf.mxu0 }
 0x114   : > { %v289_v16 = vmax.f32 %v286_v13, 0.0 }
 0x115   : > { %369 = vrot.lane.b32.xlu0 %v367_v14, %s810_s6 }
 0x116   : > { %291 = vst.msk [vmem:[%s202_s9] sm:$0xff] %vm290_vm2, %v289_v16 }
 0x119   : > { %v445_v17 = vpop.f32.mrf.mxu0 }
 0x11a   : > { %v446_v18 = vadd.f32 %v554_v8, %v445_v17 }
 0x11b   : > { %v613_v19 = vpop.f32.mrf.mxu0 }
 0x11c   : > { %v449_v20 = vmax.f32 %v446_v18, 0.0 }
 0x11e   : > { %450 = vst.msk [vmem:[%s202_s9 + $0x8] sm:$0xff] %vm290_vm2, %v449_v20 }
 0x187   : > { %v370_v21 = vpop.permute.xlu0 %369 }
 0x188   : > { %373 = vst.msk [vmem:[%s202_s9] sm:$0xff] %vm372_vm3, %v370_v21 }
 0x189   : > { %746 = shalt.err (!%p743_p10)
}
 0x18a   : > { %s747_s7 = scalar_lea.hbm %s990_s30, 256  ;;  %s751_s11 = scalar_lea.hbm %s1030_s3, 512 }
 0x18b   : > { %p748_p5 = scmp.ne.s32.totalorder %s990_s30, %s747_s7  ;;  %p752_p4 = scmp.lt.s32.totalorder %s990_s30, %s1030_s3 }
 0x18c   : > { %p753_p0 = scmp.lt.s32.totalorder %s751_s11, %s747_s7 }
 0x18d   : > { %p749_p11 = pnand %p748_p5, %p1046_p13 }
 0x18e   : > { %p754_p1 = por %p753_p0, %p752_p4 }
 0x18f   : > { %p750_p6 = pneg %p749_p11 }
 0x191   : > { %p755_p12 = pnand %p754_p1, %p750_p6 }
 0x193   : > { %758 = shalt.err (!%p755_p12)
}
 0x194   : > { %622 = dma.vmem_to_hbm [thread:$0]  (%p1046_p13), %s467_s29, 256, %s990_s30, %s452_s10  }
 0x195 PF: > { %s478_s5 = sand.u32 1, %s789_s12   ;;  %p1047_p2 = scmp.ne.s32.totalorder %s1038_s25, 0 }
 0x196   : > { %p1048_p3 = scmp.ge.s32.totalorder %s801_s15, 2  ;;  %s479_s6 = scalar_lea.sflag [#allocation4], %s478_s5 }
 0x198   : > { %p633_p7 = pnand %p1048_p3, %p1047_p2 }
 0x19a   : > { %p634_p8 = pneg %p633_p7 }
 0x19c   : > { %784 = dma.done.wait (%p634_p8), %s479_s6, 256  }
 0x19d   : > { %786 = vsyncadd (%p634_p8), %s479_s6, 4294967040  ;;  %p17_p9 = scmp.ge.s32.totalorder %s857_s18, 4   ;;  %s1049_s12 = smov %s793_s13 }
 0x19e   : > { %s1050_s13 = smov %s797_s14  ;;  %s1051_s14 = smov %s869_s21 }
 0x19f   : > { %s1052_s15 = smov %s857_s18  ;;  %19 = sbr.rel (!%p17_p9) target bundleno = 6 (0x6), region = 83 }
 0x1a4   :  { %484 = vsyncpa [#allocation3], 1 }
 0x1a5   :  { %486 = vsyncpa [#allocation3 + $0x1], 1 }
 0x1a6   :  { %487 = vsyncpa [#allocation6], 1 }
 0x1a7   :  { %488 = vsyncpa [#allocation4], 1 }
 0x1a8   :  { %490 = vsyncpa [#allocation4 + $0x1], 1 }

</bundles_post_ra>
